<compile_context>
chip_gen: v7x
topology: tpu7x:2x2x1
jax: 0.10.0
libtpu: 0.0.40
codegen_flags: <defaults>
</compile_context>

<pallas_src>
import functools

import jax
import jax.numpy as jnp
from jax.experimental import pallas as pl
from jax.experimental.pallas import tpu as pltpu


def _proj_head_kernel(x_ref, w1_ref, b1_ref, w2_ref, b2_ref, o_ref, *,
                      eps, compute_dtype):
    # x_ref : (1, C, tn)   input pixels (channels on sublane, pixels on lane)
    # w1_ref: (C, C)       conv1 weight with BN folded in (compute_dtype)
    # b1_ref: (C, 1)       conv1 bias with BN folded in (f32)
    # w2_ref: (P, C)       conv2 weight (compute_dtype)
    # b2_ref: (P, 1)       conv2 bias (f32)
    # o_ref : (1, P, tn)   L2-normalized output pixels
    x = x_ref[0].astype(compute_dtype)                                  # (C, tn)

    # conv1 (1x1) + folded BatchNorm + ReLU  -> MXU matmul (f32 acc) + VPU max
    h = jnp.dot(w1_ref[...], x, preferred_element_type=jnp.float32)    # (C, tn)
    h = jnp.maximum(h + b1_ref[...], 0.0)

    # conv2 (1x1)
    y = jnp.dot(w2_ref[...], h.astype(compute_dtype),
                preferred_element_type=jnp.float32)                    # (P, tn)
    y = y + b2_ref[...]

    # F.normalize(p=2, dim=1): per-pixel L2 over channels (sublane axis).
    # rsqrt(max(sumsq, eps^2)) == 1 / max(sqrt(sumsq), eps)  -> one EUP op per
    # pixel + one broadcast multiply (instead of sqrt + P-wide divide).
    sumsq = jnp.sum(y * y, axis=0, keepdims=True)                      # (1, tn)
    inv = jax.lax.rsqrt(jnp.maximum(sumsq, eps * eps))
    o_ref[0] = (y * inv).astype(o_ref.dtype)


def _round_down(v, m):
    return (v // m) * m


def _pick_tile_n(N, B, weight_bytes, per_lane_bytes, budget, max_tile_n):
    """Largest lane-tile (multiple of 256, fallback 128) fitting the VMEM budget."""
    avail = max(budget - weight_bytes, per_lane_bytes * 128)
    # 2x headroom over the static estimate for compiler scratch / revisits.
    cap = max(avail // (2 * per_lane_bytes), 128)
    cap = min(cap, max_tile_n)
    if B == 1:
        # Guarantee >= 2 grid steps along a parallel axis (feed both v7x TCs).
        cap = min(cap, max(N // 2, 128))
    if N <= 128:
        return N
    tn = _round_down(min(cap, N), 256)     # full MXU width on v6e/v7x
    if tn == 0:
        tn = _round_down(min(cap, N), 128)
    return max(tn, 128)


def projection_head(x, w1, b1, bn_gamma, bn_beta, bn_mean, bn_var, w2, b2,
                    *, bn_eps=1e-5, norm_eps=1e-12,
                    compute_dtype=jnp.float32, max_tile_n=2048):
    """JAX/Pallas equivalent of ProjectionHead.forward (proj='convmlp', eval BN)."""
    B, C, H, W = x.shape
    P = w2.shape[0]
    N = H * W
    out_dtype = x.dtype

    # Fold eval-mode BatchNorm into conv1 in f32 (parameter-only math, once),
    # THEN cast the folded weights to the compute dtype.
    scale = (bn_gamma.astype(jnp.float32)
             / jnp.sqrt(bn_var.astype(jnp.float32) + bn_eps))            # (C,)
    w1f = (w1.astype(jnp.float32) * scale[:, None]).astype(compute_dtype)  # (C, C)
    b1f = (scale * (b1.astype(jnp.float32) - bn_mean.astype(jnp.float32))
           + bn_beta.astype(jnp.float32))                                 # (C,)
    w2c = w2.astype(compute_dtype)                                        # (P, C)
    b2c = b2.astype(jnp.float32)                                          # (P,)

    # Lane-dense spatial layout: (B, C, H, W) -> (B, C, N); no data movement.
    x2 = x.reshape(B, C, N)

    # --- Per-chip VMEM budgeting ------------------------------------------
    try:
        vmem_cap = int(pltpu.get_tpu_info().vmem_capacity_bytes)
    except Exception:
        vmem_cap = 64 * 1024 * 1024                       # v7x-safe default
    budget = min(int(0.75 * vmem_cap), 48 * 1024 * 1024)

    in_bytes = jnp.dtype(x.dtype).itemsize
    out_bytes = jnp.dtype(out_dtype).itemsize
    cdt_bytes = jnp.dtype(compute_dtype).itemsize

    # Resident weights (single-buffered) + biases (f32).
    weight_bytes = (C * C + P * C) * cdt_bytes + (C + P) * 4
    # Per-lane cost: 2x input tile, 2x output tile, compute-dtype casts of x
    # and h, f32 intermediates h and y.
    per_lane = (2 * C * in_bytes + 2 * P * out_bytes
                + 2 * C * cdt_bytes + P * cdt_bytes + (C + P) * 4)

    tn = _pick_tile_n(N, B, weight_bytes, per_lane, budget, max_tile_n)
    grid = (B, pl.cdiv(N, tn))           # partial last block handled by Pallas
    vmem_limit = budget

    kernel = functools.partial(_proj_head_kernel, eps=norm_eps,
                               compute_dtype=compute_dtype)

    def build(weight_mode):
        def wspec(shape):
            if weight_mode is None:
                return pl.BlockSpec(shape, lambda b, j: (0, 0))
            return pl.BlockSpec(shape, lambda b, j: (0, 0),
                                pipeline_mode=weight_mode)
        return pl.pallas_call(
            kernel,
            out_shape=jax.ShapeDtypeStruct((B, P, N), out_dtype),
            grid_spec=pltpu.PrefetchScalarGridSpec(
                num_scalar_prefetch=0,
                grid=grid,
                in_specs=[
                    pl.BlockSpec((1, C, tn), lambda b, j: (b, 0, j)),
                    wspec((C, C)),       # constant index_map -> fetched once
                    wspec((C, 1)),
                    wspec((P, C)),
                    wspec((P, 1)),
                ],
                out_specs=pl.BlockSpec((1, P, tn), lambda b, j: (b, 0, j)),
            ),
            compiler_params=pltpu.CompilerParams(
                dimension_semantics=("parallel", "parallel"),
                vmem_limit_bytes=vmem_limit,
            ),
        )

    args = (x2, w1f, b1f[:, None], w2c, b2c[:, None])
    try:
        # Single-buffer the resident weights (constant index_map) to save VMEM.
        out = build(pl.Buffered(1))(*args)
    except Exception:
        # Older/newer Pallas versions may reject pipeline_mode here; default
        # double-buffering is functionally identical (just uses more VMEM).
        out = build(None)(*args)

    return out.reshape(B, P, H, W)


def _reference(x, w1, b1, bn_gamma, bn_beta, bn_mean, bn_var, w2, b2,
               bn_eps=1e-5, norm_eps=1e-12):
    """Pure-JAX reference matching PyTorch's unfused forward (eval-mode BN)."""
    y = jnp.einsum('oc,bchw->bohw', w1, x) + b1[None, :, None, None]
    y = (y - bn_mean[None, :, None, None]) / jnp.sqrt(
        bn_var[None, :, None, None] + bn_eps)
    y = y * bn_gamma[None, :, None, None] + bn_beta[None, :, None, None]
    y = jnp.maximum(y, 0.0)
    z = jnp.einsum('pc,bchw->bphw', w2, y) + b2[None, :, None, None]
    n = jnp.sqrt(jnp.sum(z * z, axis=1, keepdims=True))
    return z / jnp.maximum(n, norm_eps)


if __name__ == "__main__":
    key = jax.random.PRNGKey(0)
    keys = jax.random.split(key, 10)

    B, C, P, H, W = 2, 32, 64, 16, 16   # dim_in=32, proj_dim=64

    x = jax.random.normal(keys[0], (B, C, H, W), dtype=jnp.float32)
    w1 = jax.random.normal(keys[1], (C, C), dtype=jnp.float32) * 0.1
    b1 = jax.random.normal(keys[2], (C,), dtype=jnp.float32) * 0.1
    bn_gamma = 1.0 + 0.1 * jax.random.normal(keys[3], (C,), dtype=jnp.float32)
    bn_beta = 0.1 * jax.random.normal(keys[4], (C,), dtype=jnp.float32)
    bn_mean = 0.1 * jax.random.normal(keys[5], (C,), dtype=jnp.float32)
    bn_var = jax.random.uniform(keys[6], (C,), dtype=jnp.float32,
                                minval=0.5, maxval=1.5)
    w2 = jax.random.normal(keys[7], (P, C), dtype=jnp.float32) * 0.1
    b2 = jax.random.normal(keys[8], (P,), dtype=jnp.float32) * 0.1

    ref = _reference(x, w1, b1, bn_gamma, bn_beta, bn_mean, bn_var, w2, b2)

    # f32 datapath: must match the unfused reference tightly.
    out = projection_head(x, w1, b1, bn_gamma, bn_beta, bn_mean, bn_var, w2, b2,
                          compute_dtype=jnp.float32)
    out = jax.block_until_ready(out)
    assert out.shape == (B, P, H, W)
    assert jnp.allclose(out, ref, atol=1e-4, rtol=1e-4)
    assert jnp.allclose(jnp.sum(out * out, axis=1), 1.0, atol=1e-3)

    # bf16 MXU datapath (the recommended mode when dim_in is large and the
    # kernel is MXU-bound on v6e/v7x): looser tolerance, still unit-norm.
    out_bf16 = projection_head(x, w1, b1, bn_gamma, bn_beta, bn_mean, bn_var,
                               w2, b2, compute_dtype=jnp.bfloat16)
    out_bf16 = jax.block_until_ready(out_bf16)
    assert out_bf16.shape == (B, P, H, W)
    assert jnp.allclose(out_bf16, ref, atol=5e-2, rtol=5e-2)
    assert jnp.allclose(jnp.sum(out_bf16 * out_bf16, axis=1), 1.0, atol=1e-2)

    print("KERNEL_OK")
</pallas_src>

<mosaic_0001>
module attributes {stable_mosaic.version = 11 : i64} {
  func.func @_proj_head_kernel(%arg0: i32, %arg1: i32, %arg2: memref<1x32x256xf32, #tpu.memory_space<vmem>>, %arg3: memref<32x32xf32, #tpu.memory_space<vmem>>, %arg4: memref<32x1xf32, #tpu.memory_space<vmem>>, %arg5: memref<64x32xf32, #tpu.memory_space<vmem>>, %arg6: memref<64x1xf32, #tpu.memory_space<vmem>>, %arg7: memref<1x64x256xf32, #tpu.memory_space<vmem>>) attributes {dimension_semantics = [#tpu.dimension_semantics<parallel>, #tpu.dimension_semantics<parallel>], iteration_bounds = array<i64: 2, 1>, scalar_prefetch = 0 : i64, scratch_operands = 0 : i64, tpu.core_type = #tpu.core_type<tc>, window_params = [{transform_indices = @transform_0, window_bounds = array<i64: 1, 32, 256>}, {pipeline_mode = #tpu.pipeline_mode<synchronous>, transform_indices = @transform_1, window_bounds = array<i64: 32, 32>}, {pipeline_mode = #tpu.pipeline_mode<synchronous>, transform_indices = @transform_2, window_bounds = array<i64: 32, 1>}, {pipeline_mode = #tpu.pipeline_mode<synchronous>, transform_indices = @transform_3, window_bounds = array<i64: 64, 32>}, {pipeline_mode = #tpu.pipeline_mode<synchronous>, transform_indices = @transform_4, window_bounds = array<i64: 64, 1>}, {transform_indices = @transform_5, window_bounds = array<i64: 1, 64, 256>}]} {
    %c0 = arith.constant 0 : index
    %c0_0 = arith.constant 0 : index
    %c0_1 = arith.constant 0 : index
    %0 = vector.load %arg2[%c0, %c0_0, %c0_1] : memref<1x32x256xf32, #tpu.memory_space<vmem>>, vector<1x32x256xf32>
    %1 = vector.shape_cast %0 : vector<1x32x256xf32> to vector<32x256xf32>
    %c0_2 = arith.constant 0 : index
    %c0_3 = arith.constant 0 : index
    %2 = vector.load %arg3[%c0_2, %c0_3] : memref<32x32xf32, #tpu.memory_space<vmem>>, vector<32x32xf32>
    %cst = arith.constant dense<0.000000e+00> : vector<32x256xf32>
    %3 = tpu.matmul %2, %1, %cst {dimension_numbers = #tpu.dot_dimension_numbers<[1], [0], [0], [1], [0, 0, 1, 1], [], []>} : vector<32x32xf32>, vector<32x256xf32>, vector<32x256xf32> -> vector<32x256xf32>
    %c0_4 = arith.constant 0 : index
    %c0_5 = arith.constant 0 : index
    %4 = vector.load %arg4[%c0_4, %c0_5] : memref<32x1xf32, #tpu.memory_space<vmem>>, vector<32x1xf32>
    %5 = vector.broadcast %4 : vector<32x1xf32> to vector<32x256xf32>
    %6 = arith.addf %3, %5 : vector<32x256xf32>
    %cst_6 = arith.constant 0.000000e+00 : f32
    %7 = vector.broadcast %cst_6 : f32 to vector<32x256xf32>
    %8 = arith.maximumf %6, %7 : vector<32x256xf32>
    %c0_7 = arith.constant 0 : index
    %c0_8 = arith.constant 0 : index
    %9 = vector.load %arg5[%c0_7, %c0_8] : memref<64x32xf32, #tpu.memory_space<vmem>>, vector<64x32xf32>
    %cst_9 = arith.constant dense<0.000000e+00> : vector<64x256xf32>
    %10 = tpu.matmul %9, %8, %cst_9 {dimension_numbers = #tpu.dot_dimension_numbers<[1], [0], [0], [1], [0, 0, 1, 1], [], []>} : vector<64x32xf32>, vector<32x256xf32>, vector<64x256xf32> -> vector<64x256xf32>
    %c0_10 = arith.constant 0 : index
    %c0_11 = arith.constant 0 : index
    %11 = vector.load %arg6[%c0_10, %c0_11] : memref<64x1xf32, #tpu.memory_space<vmem>>, vector<64x1xf32>
    %12 = vector.broadcast %11 : vector<64x1xf32> to vector<64x256xf32>
    %13 = arith.addf %10, %12 : vector<64x256xf32>
    %14 = arith.mulf %13, %13 : vector<64x256xf32>
    %cst_12 = arith.constant dense<0.000000e+00> : vector<256xf32>
    %15 = vector.multi_reduction <add>, %14, %cst_12 [0] : vector<64x256xf32> to vector<256xf32>
    %16 = vector.shape_cast %15 : vector<256xf32> to vector<1x256xf32>
    %cst_13 = arith.constant 1.000000e-24 : f32
    %17 = vector.broadcast %cst_13 : f32 to vector<1x256xf32>
    %18 = arith.maximumf %16, %17 : vector<1x256xf32>
    %19 = math.rsqrt %18 : vector<1x256xf32>
    %20 = vector.broadcast %19 : vector<1x256xf32> to vector<64x256xf32>
    %21 = arith.mulf %13, %20 : vector<64x256xf32>
    %c0_14 = arith.constant 0 : index
    %c0_15 = arith.constant 0 : index
    %c0_16 = arith.constant 0 : index
    %22 = vector.load %arg7[%c0_14, %c0_15, %c0_16] : memref<1x64x256xf32, #tpu.memory_space<vmem>>, vector<1x64x256xf32>
    %23 = vector.shape_cast %22 : vector<1x64x256xf32> to vector<64x256xf32>
    %24 = vector.shape_cast %21 : vector<64x256xf32> to vector<1x64x256xf32>
    tpu.vector_store %arg7[%c0_14, %c0_15, %c0_16], %24 {strides = array<i32>} : memref<1x64x256xf32, #tpu.memory_space<vmem>>, vector<1x64x256xf32>,
    return
  }
  func.func @transform_0(%arg0: i32, %arg1: i32) -> (i32, i32, i32) {
    %c0_i32 = arith.constant 0 : i32
    %c0_i32_0 = arith.constant 0 : i32
    return %arg0, %c0_i32, %arg1 : i32, i32, i32
  }
  func.func @transform_1(%arg0: i32, %arg1: i32) -> (i32, i32) {
    %c0_i32 = arith.constant 0 : i32
    %c0_i32_0 = arith.constant 0 : i32
    %c0_i32_1 = arith.constant 0 : i32
    return %c0_i32, %c0_i32_0 : i32, i32
  }
  func.func @transform_2(%arg0: i32, %arg1: i32) -> (i32, i32) {
    %c0_i32 = arith.constant 0 : i32
    %c0_i32_0 = arith.constant 0 : i32
    %c0_i32_1 = arith.constant 0 : i32
    return %c0_i32, %c0_i32_0 : i32, i32
  }
  func.func @transform_3(%arg0: i32, %arg1: i32) -> (i32, i32) {
    %c0_i32 = arith.constant 0 : i32
    %c0_i32_0 = arith.constant 0 : i32
    %c0_i32_1 = arith.constant 0 : i32
    return %c0_i32, %c0_i32_0 : i32, i32
  }
  func.func @transform_4(%arg0: i32, %arg1: i32) -> (i32, i32) {
    %c0_i32 = arith.constant 0 : i32
    %c0_i32_0 = arith.constant 0 : i32
    %c0_i32_1 = arith.constant 0 : i32
    return %c0_i32, %c0_i32_0 : i32, i32
  }
  func.func @transform_5(%arg0: i32, %arg1: i32) -> (i32, i32, i32) {
    %c0_i32 = arith.constant 0 : i32
    %c0_i32_0 = arith.constant 0 : i32
    return %arg0, %c0_i32, %arg1 : i32, i32, i32
  }
}

module attributes {stable_mosaic.version = 11 : i64} {
  func.func @_proj_head_kernel(%arg0: i32, %arg1: i32, %arg2: memref<1x32x256xf32, #tpu.memory_space<vmem>>, %arg3: memref<32x32xf32, #tpu.memory_space<vmem>>, %arg4: memref<32x1xf32, #tpu.memory_space<vmem>>, %arg5: memref<64x32xf32, #tpu.memory_space<vmem>>, %arg6: memref<64x1xf32, #tpu.memory_space<vmem>>, %arg7: memref<1x64x256xf32, #tpu.memory_space<vmem>>) attributes {dimension_semantics = [#tpu.dimension_semantics<parallel>, #tpu.dimension_semantics<parallel>], iteration_bounds = array<i64: 2, 1>, scalar_prefetch = 0 : i64, scratch_operands = 0 : i64, tpu.core_type = #tpu.core_type<tc>, window_params = [{transform_indices = @transform_0, window_bounds = array<i64: 1, 32, 256>}, {pipeline_mode = #tpu.pipeline_mode<synchronous>, transform_indices = @transform_1, window_bounds = array<i64: 32, 32>}, {pipeline_mode = #tpu.pipeline_mode<synchronous>, transform_indices = @transform_2, window_bounds = array<i64: 32, 1>}, {pipeline_mode = #tpu.pipeline_mode<synchronous>, transform_indices = @transform_3, window_bounds = array<i64: 64, 32>}, {pipeline_mode = #tpu.pipeline_mode<synchronous>, transform_indices = @transform_4, window_bounds = array<i64: 64, 1>}, {transform_indices = @transform_5, window_bounds = array<i64: 1, 64, 256>}]} {
    %c0 = arith.constant 0 : index
    %c0_0 = arith.constant 0 : index
    %c0_1 = arith.constant 0 : index
    %0 = vector.load %arg2[%c0, %c0_0, %c0_1] : memref<1x32x256xf32, #tpu.memory_space<vmem>>, vector<1x32x256xf32>
    %1 = vector.shape_cast %0 : vector<1x32x256xf32> to vector<32x256xf32>
    %c0_2 = arith.constant 0 : index
    %c0_3 = arith.constant 0 : index
    %2 = vector.load %arg3[%c0_2, %c0_3] : memref<32x32xf32, #tpu.memory_space<vmem>>, vector<32x32xf32>
    %cst = arith.constant dense<0.000000e+00> : vector<32x256xf32>
    %3 = tpu.matmul %2, %1, %cst {dimension_numbers = #tpu.dot_dimension_numbers<[1], [0], [0], [1], [0, 0, 1, 1], [], []>} : vector<32x32xf32>, vector<32x256xf32>, vector<32x256xf32> -> vector<32x256xf32>
    %c0_4 = arith.constant 0 : index
    %c0_5 = arith.constant 0 : index
    %4 = vector.load %arg4[%c0_4, %c0_5] : memref<32x1xf32, #tpu.memory_space<vmem>>, vector<32x1xf32>
    %5 = vector.broadcast %4 : vector<32x1xf32> to vector<32x256xf32>
    %6 = arith.addf %3, %5 : vector<32x256xf32>
    %cst_6 = arith.constant 0.000000e+00 : f32
    %7 = vector.broadcast %cst_6 : f32 to vector<32x256xf32>
    %8 = arith.maximumf %6, %7 : vector<32x256xf32>
    %c0_7 = arith.constant 0 : index
    %c0_8 = arith.constant 0 : index
    %9 = vector.load %arg5[%c0_7, %c0_8] : memref<64x32xf32, #tpu.memory_space<vmem>>, vector<64x32xf32>
    %cst_9 = arith.constant dense<0.000000e+00> : vector<64x256xf32>
    %10 = tpu.matmul %9, %8, %cst_9 {dimension_numbers = #tpu.dot_dimension_numbers<[1], [0], [0], [1], [0, 0, 1, 1], [], []>} : vector<64x32xf32>, vector<32x256xf32>, vector<64x256xf32> -> vector<64x256xf32>
    %c0_10 = arith.constant 0 : index
    %c0_11 = arith.constant 0 : index
    %11 = vector.load %arg6[%c0_10, %c0_11] : memref<64x1xf32, #tpu.memory_space<vmem>>, vector<64x1xf32>
    %12 = vector.broadcast %11 : vector<64x1xf32> to vector<64x256xf32>
    %13 = arith.addf %10, %12 : vector<64x256xf32>
    %14 = arith.mulf %13, %13 : vector<64x256xf32>
    %cst_12 = arith.constant dense<0.000000e+00> : vector<256xf32>
    %15 = vector.multi_reduction <add>, %14, %cst_12 [0] : vector<64x256xf32> to vector<256xf32>
    %16 = vector.shape_cast %15 : vector<256xf32> to vector<1x256xf32>
    %cst_13 = arith.constant 1.000000e-24 : f32
    %17 = vector.broadcast %cst_13 : f32 to vector<1x256xf32>
    %18 = arith.maximumf %16, %17 : vector<1x256xf32>
    %19 = math.rsqrt %18 : vector<1x256xf32>
    %20 = vector.broadcast %19 : vector<1x256xf32> to vector<64x256xf32>
    %21 = arith.mulf %13, %20 : vector<64x256xf32>
    %c0_14 = arith.constant 0 : index
    %c0_15 = arith.constant 0 : index
    %c0_16 = arith.constant 0 : index
    %22 = vector.load %arg7[%c0_14, %c0_15, %c0_16] : memref<1x64x256xf32, #tpu.memory_space<vmem>>, vector<1x64x256xf32>
    %23 = vector.shape_cast %22 : vector<1x64x256xf32> to vector<64x256xf32>
    %24 = vector.shape_cast %21 : vector<64x256xf32> to vector<1x64x256xf32>
    tpu.vector_store %arg7[%c0_14, %c0_15, %c0_16], %24 {strides = array<i32>} : memref<1x64x256xf32, #tpu.memory_space<vmem>>, vector<1x64x256xf32>,
    return
  }
  func.func @transform_0(%arg0: i32, %arg1: i32) -> (i32, i32, i32) {
    %c0_i32 = arith.constant 0 : i32
    %c0_i32_0 = arith.constant 0 : i32
    return %arg0, %c0_i32, %arg1 : i32, i32, i32
  }
  func.func @transform_1(%arg0: i32, %arg1: i32) -> (i32, i32) {
    %c0_i32 = arith.constant 0 : i32
    %c0_i32_0 = arith.constant 0 : i32
    %c0_i32_1 = arith.constant 0 : i32
    return %c0_i32, %c0_i32_0 : i32, i32
  }
  func.func @transform_2(%arg0: i32, %arg1: i32) -> (i32, i32) {
    %c0_i32 = arith.constant 0 : i32
    %c0_i32_0 = arith.constant 0 : i32
    %c0_i32_1 = arith.constant 0 : i32
    return %c0_i32, %c0_i32_0 : i32, i32
  }
  func.func @transform_3(%arg0: i32, %arg1: i32) -> (i32, i32) {
    %c0_i32 = arith.constant 0 : i32
    %c0_i32_0 = arith.constant 0 : i32
    %c0_i32_1 = arith.constant 0 : i32
    return %c0_i32, %c0_i32_0 : i32, i32
  }
  func.func @transform_4(%arg0: i32, %arg1: i32) -> (i32, i32) {
    %c0_i32 = arith.constant 0 : i32
    %c0_i32_0 = arith.constant 0 : i32
    %c0_i32_1 = arith.constant 0 : i32
    return %c0_i32, %c0_i32_0 : i32, i32
  }
  func.func @transform_5(%arg0: i32, %arg1: i32) -> (i32, i32, i32) {
    %c0_i32 = arith.constant 0 : i32
    %c0_i32_0 = arith.constant 0 : i32
    return %arg0, %c0_i32, %arg1 : i32, i32, i32
  }
}

</mosaic_0001>

<bundles_post_ra>
// kernel: tpu_custom_call.1
= control target key start
LH: loop header
LB: loop body
LE: loop exit
PB: predicated region body
PF: predicated region fallthrough
CT: control target
= control target key end

     0   :  { %10 = vsyncpa [#allocation3], 0  ;;  %s1287_s0 = inlined_call_operand.vmem [shape: f32[2,32,256], index: 0, kind: input, shape index: {}]   ;;  %s1288_s1 = inlined_call_operand.vmem [shape: f32[32,32], index: 1, kind: input, shape index: {}]   ;;  %s1289_s2 = inlined_call_operand.vmem [shape: f32[32,1], index: 2, kind: input, shape index: {}]   ;;  %s1290_s3 = inlined_call_operand.vmem [shape: f32[64,32], index: 3, kind: input, shape index: {}]   ;;  %s1291_s4 = inlined_call_operand.vmem [shape: f32[64,1], index: 4, kind: input, shape index: {}]   ;;  %s1292_s5 = inlined_call_operand.hbm [shape: f32[2,64,256], index: 5, kind: output, shape index: {}]  }
   0x1   :  { %12 = vsyncpa [#allocation3 + $0x1], 0  ;;  %s993_s18 = smov 0   ;;  %s995_s19 = smov 0  }
   0x2   :  { %s997_s20 = smov 0   ;;  %s999_s21 = smov 0  }
   0x3   :  { %s1001_s22 = smov 0   ;;  %s1003_s23 = smov 0  }
   0x4 LB: > { %s766_s24 = sadd.s32 4294967295, %s956_s23   ;;  %s767_s25 = sadd.s32 4294967294, %s956_s23   ;;  %s956_s23 = sphi %s1003_s23, %s18_s23   ;;  %s952_s22 = sphi %s1001_s22, %s1299_s22   ;;  %s948_s21 = sphi %s999_s21, %s1298_s21   ;;  %s944_s20 = sphi %s997_s20, %s1297_s20   ;;  %s940_s19 = sphi %s995_s19, %s1296_s19   ;;  %s936_s18 = sphi %s993_s18, %s1295_s18  }
   0x5   : > { %s30_s26 = sadd.s32 1, %s952_s22  ;;  %s151_s27 = sadd.s32 1, %s944_s20 }
   0x6   : > { %p32_p0 = scmp.ge.s32.totalorder %s30_s26, 2  ;;  %p161_p1 = scmp.ne.s32.totalorder %s944_s20, %s940_s19 }
   0x7   : > { %p162_p2 = scmp.eq.s32.totalorder %s766_s24, 1  ;;  %p167_p3 = scmp.ne.s32.totalorder %s940_s19, %s936_s18 }
   0x8   : > { %s1301_s26 = smov (%p32_p0, %s30_s26), 0  ;;  %p168_p5 = scmp.eq.s32.totalorder %s767_s25, 1 }
   0x9   : > { %p1033_p4 = por %p162_p2, %p161_p1  ;;  %s146_s29 = ssub.s32 %s952_s22, %s1301_s26 }
   0xa   : > { %p770_p6 = scmp.ge.s32.totalorder %s956_s23, 1  ;;  %p149_p7 = scmp.eq.s32.totalorder %s146_s29, 0 }
   0xb   : > { %p1040_p8 = por %p168_p5, %p167_p3  ;;  %p211_p9 = scmp.lt.s32.totalorder %s956_s23, 3 }
   0xc   : > { %s1046_s6 = scalar_select %p149_p7, %s944_s20, %s151_s27  }
   0xd   : > { %p212_p10 = pnand %p770_p6, %p211_p9 }
   0xe   : > { %p244_p11 = scmp.lt.s32.totalorder (!%p212_p10), %s948_s21, 1  ;;  %v958_v0 = vmov (!%p212_p10), 0.0   ;;  %v266_v1 = vld [vmem:[%s1289_s2] sm:$0xff] (!%p212_p10)  ;;  %v959_v2 = vmov (!%p212_p10), 0   ;;  %v268_v3 = vld [vmem:[%s1289_s2 + $0x10] sm:$0xff] (!%p212_p10)  ;;  %v267_v4 = vld [vmem:[%s1289_s2 + $0x8] sm:$0xff] (!%p212_p10) }
   0xf   : > { %215 = sbr.rel (%p212_p10) target bundleno = 560 (0x230), region = 40  ;;  %367 = vmatprep.mubr.f32.mxu0 (!%p212_p10), %v958_v0  ;;  %556 = vmatprep.mubr.f32.mxu1 (!%p212_p10), %v958_v0  ;;  %v269_v5 = vld [vmem:[%s1289_s2 + $0x18] sm:$0xff] (!%p212_p10)  ;;  %v408_v17 = vld [vmem:[%s1291_s4] sm:$0xff] (!%p212_p10)  ;;  %v409_v18 = vld [vmem:[%s1291_s4 + $0x8] sm:$0xff] (!%p212_p10)  ;;  %vm290_vm0 = vcmask (!%p212_p10), 261120   ;;  %s240_s15 = sand.u32 (!%p212_p10), 1, %s940_s19  }
  0x10   : > { %872 = vset.pattern.permute.xlu0 (!%p212_p10), %v959_v2  ;;  %873 = vset.pattern.permute.xlu1 (!%p212_p10), %v959_v2  ;;  %v410_v20 = vld [vmem:[%s1291_s4 + $0x10] sm:$0xff] (!%p212_p10)  ;;  %v411_v21 = vld [vmem:[%s1291_s4 + $0x18] sm:$0xff] (!%p212_p10)  ;;  %v262_v22 = vld [vmem:[%s1288_s1] sm:$0xff] (!%p212_p10)  ;;  %s771_s16 = sshll.u32 (!%p212_p10), %s240_s15, 7  ;;  %s792_s17 = sshll.u32 (!%p212_p10), %s948_s21, 11 }
  0x11   : > { %272 = vperm.xlu0 (!%p212_p10), %872, %v266_v1   ;;  %282 = vperm.xlu1 (!%p212_p10), %873, %v268_v3   ;;  %v412_v23 = vld [vmem:[%s1291_s4 + $0x20] sm:$0xff] (!%p212_p10)  ;;  %v413_v24 = vld [vmem:[%s1291_s4 + $0x28] sm:$0xff] (!%p212_p10)  ;;  %v414_v26 = vld [vmem:[%s1291_s4 + $0x30] sm:$0xff] (!%p212_p10)  ;;  %s1201_s24 = scalar_lea.vmem (!%p212_p10), [#allocation2], %s771_s16  ;;  %s1221_s29 = scalar_lea.hbm (!%p212_p10), %s1292_s5, %s792_s17 }
  0x12   : > { %v263_v25 = vld [vmem:[%s1288_s1 + $0x8] sm:$0xff] (!%p212_p10)  ;;  %v415_v27 = vld [vmem:[%s1291_s4 + $0x38] sm:$0xff] (!%p212_p10)  ;;  %v264_v28 = vld [vmem:[%s1288_s1 + $0x10] sm:$0xff] (!%p212_p10)  ;;  %s1241_s7 = scalar_lea.sflag (!%p212_p10), [#allocation3], %s240_s15 }
  0x13   : > { %v265_v29 = vld [vmem:[%s1288_s1 + $0x18] sm:$0xff] (!%p212_p10)  ;;  %v400_v62 = vld [vmem:[%s1290_s3] sm:$0xff] (!%p212_p10)  ;;  %v402_v63 = vld [vmem:[%s1290_s3 + $0x10] sm:$0xff] (!%p212_p10) }
  0x14   : > { %v401_v1 = vld [vmem:[%s1290_s3 + $0x8] sm:$0xff] (!%p212_p10)  ;;  %v403_v2 = vld [vmem:[%s1290_s3 + $0x18] sm:$0xff] (!%p212_p10)  ;;  %v404_v3 = vld [vmem:[%s1290_s3 + $0x20] sm:$0xff] (!%p212_p10) }
  0x15   : > { %277 = vperm.xlu0 (!%p212_p10), %872, %v267_v4   ;;  %287 = vperm.xlu1 (!%p212_p10), %873, %v269_v5   ;;  %v405_v4 = vld [vmem:[%s1290_s3 + $0x28] sm:$0xff] (!%p212_p10)  ;;  %v406_v5 = vld [vmem:[%s1290_s3 + $0x30] sm:$0xff] (!%p212_p10) }
  0x16   : > { %s245_s9 = scalar_select %p244_p11, %s948_s21, 1 }
  0x18   : > { %s791_s12 = sshll.u32 %s245_s9, 6  ;;  %s960_s9 = smov [#allocation2]  }
  0x19   : > { %s251_s25 = scalar_lea.vmem %s1287_s0, %s791_s12  ;;  %418 = vperm.xlu0 %872, %v408_v17   ;;  %423 = vperm.xlu1 %873, %v409_v18   ;;  %s882_s10 = sshll.u32 %s960_s9, 4  ;;  %s883_s10 = int_to_ptr.vmem [resolvable:$false] %s882_s10 }
  0x1a   : > { %v255_v6 = vld [vmem:[%s251_s25 + $0x8] sm:$0xff]  ;;  %v257_v7 = vld [vmem:[%s251_s25 + $0x18] sm:$0xff]  ;;  %v254_v8 = vld [vmem:[%s251_s25] sm:$0xff]  ;;  %s884_s11 = scalar_lea.vmem %s883_s10, 4096 }
  0x1b   : > { %v793_v9 = vpack.c.bf16 %v257_v7, %v255_v6  ;;  %v256_v10 = vld [vmem:[%s251_s25 + $0x10] sm:$0xff]  ;;  %v259_v11 = vld [vmem:[%s251_s25 + $0x28] sm:$0xff]  ;;  %v261_v12 = vld [vmem:[%s251_s25 + $0x38] sm:$0xff] }
  0x1c   : > { %v795_v13 = vpack.c.bf16 %v256_v10, %v254_v8  ;;  %v797_v14 = vpack.c.bf16 %v261_v12, %v259_v11  ;;  %v258_v15 = vld [vmem:[%s251_s25 + $0x20] sm:$0xff]  ;;  %v260_v16 = vld [vmem:[%s251_s25 + $0x30] sm:$0xff]  ;;  %v407_v6 = vld [vmem:[%s1290_s3 + $0x38] sm:$0xff]  ;;  %s687_s25 = sshll.u32 %s1201_s24, 4  ;;  %s1223_s25 = int_to_ptr.vmem [resolvable:$true] %s687_s25 }
  0x1d   : > { %794 = vmatprep.subr.bf16.mxu0 %v793_v9  ;;  %v799_v19 = vpack.c.bf16 %v260_v16, %v258_v15  ;;  %428 = vperm.xlu0 %872, %v410_v20   ;;  %s878_s8 = scalar_lea.vmem %s1223_s25, 2048  ;;  %p885_p1 = scmp.lt.s32.totalorder %s1223_s25, %s883_s10 }
  0x1e   : > { %796 = vmatpush1.bf16.msra.mxu0 %v795_v13  ;;  %433 = vperm.xlu1 %873, %v411_v21   ;;  %p879_p12 = scmp.ne.s32.totalorder %s1223_s25, %s878_s8  ;;  %p886_p2 = scmp.lt.s32.totalorder %s884_s11, %s878_s8 }
  0x1f   : > { %798 = vmatprep.subr.bf16.mxu0 %v797_v14 }
  0x20   : > { %p880_p13 = pnand %p879_p12, %p1033_p4  ;;  %p887_p3 = por %p886_p2, %p885_p1 }
  0x21   : > { %438 = vperm.xlu0 %872, %v412_v23  }
  0x22   : > { %800 = vmatpush1.bf16.msra.mxu0 %v799_v19  ;;  %443 = vperm.xlu1 %873, %v413_v24   ;;  %p881_p0 = pneg %p880_p13 }
  0x24   : > { %p888_p5 = pnand %p887_p3, %p881_p0 }
  0x25   : > { %774 = vmatmul.mubr.msk.f32.vlgmr.msra.gmra.mrb[0].mxu0 %vm290_vm0, %v262_v22  ;;  %448 = vperm.xlu0 %872, %v414_v26  }
  0x26   : > { %373 = vmatprep.mubr.f32.mxu0 %v958_v0  ;;  %453 = vperm.xlu1 %873, %v415_v27  }
  0x29   : > { %775 = vmatmul.mubr.msk.f32.gmra.mrb[2].mxu0 %vm290_vm0, %v263_v25 }
  0x2a   : > { %379 = vmatprep.mubr.f32.mxu0 %v958_v0 }
  0x2d   : > { %776 = vmatmul.mubr.msk.f32.gmra.mrb[4].mxu0 %vm290_vm0, %v264_v28 }
  0x2e   : > { %385 = vmatprep.mubr.f32.mxu0 %v958_v0 }
  0x31   : > { %777 = vmatmul.mubr.msk.f32.gmra.mrb[6].mxu0 %vm290_vm0, %v265_v29 }
  0x32   : > { %544 = vmatprep.mubr.f32.mxu0 %v958_v0 }
  0x90   : > { %v273_v30 = vpop.permute.xlu0 %272  ;;  %v283_v39 = vpop.permute.xlu1 %282 }
  0x94   : > { %v278_v34 = vpop.permute.xlu0 %277  ;;  %v288_v50 = vpop.permute.xlu1 %287 }
  0x98   : > { %v419_v7 = vpop.permute.xlu0 %418  ;;  %v424_v8 = vpop.permute.xlu1 %423 }
  0x9c   : > { %v429_v13 = vpop.permute.xlu0 %428 }
  0x9d   : > { %v434_v21 = vpop.permute.xlu1 %433 }
  0xa0   : > { %v439_v27 = vpop.permute.xlu0 %438 }
  0xf8   : > { %v369_v31 = vpop.f32.mrb[0].mxu0 }
  0xf9   : > { %v371_v32 = vpop.f32.mrb[1].mxu0  ;;  %v370_v33 = vadd.f32 %v369_v31, %v273_v30 }
  0xfa   : > { %v372_v35 = vadd.f32 %v371_v32, %v273_v30 }
  0xfb   : > { %v392_v41 = vmax.f32 %v370_v33, 0.0 }
  0xfc   : > { %v375_v36 = vpop.f32.mrb[2].mxu0  ;;  %v393_v43 = vmax.f32 %v372_v35, 0.0 }
  0xfd   : > { %v376_v37 = vadd.f32 %v375_v36, %v278_v34  ;;  %v377_v38 = vpop.f32.mrb[3].mxu0 }
  0xfe   : > { %v378_v40 = vadd.f32 %v377_v38, %v278_v34 }
  0xff   : > { %v394_v42 = vmax.f32 %v376_v37, 0.0 }
 0x100   : > { %v395_v44 = vmax.f32 %v378_v40, 0.0  ;;  %v381_v45 = vpop.f32.mrb[4].mxu0 }
 0x101   : > { %v803_v46 = vpack.c.bf16 %v394_v42, %v392_v41  ;;  %v383_v47 = vpop.f32.mrb[5].mxu0  ;;  %v382_v49 = vadd.f32 %v381_v45, %v283_v39  ;;  %v444_v41 = vpop.permute.xlu1 %443 }
 0x102   : > { %v801_v48 = vpack.c.bf16 %v395_v44, %v393_v43  ;;  %v384_v51 = vadd.f32 %v383_v47, %v283_v39 }
 0x103   : > { %v396_v56 = vmax.f32 %v382_v49, 0.0 }
 0x104   : > { %v387_v52 = vpop.f32.mrb[6].mxu0  ;;  %802 = vmatprep.subr.bf16.mxu0 %v801_v48  ;;  %809 = vmatprep.subr.bf16.mxu1 %v801_v48  ;;  %v397_v58 = vmax.f32 %v384_v51, 0.0 }
 0x105   : > { %v388_v53 = vadd.f32 %v387_v52, %v288_v50  ;;  %v389_v54 = vpop.f32.mrb[7].mxu0  ;;  %804 = vmatpush1.bf16.msra.mxu0 %v803_v46  ;;  %811 = vmatpush1.bf16.msra.mxu1 %v803_v46 }
 0x106   : > { %v390_v55 = vadd.f32 %v389_v54, %v288_v50  ;;  %v449_v54 = vpop.permute.xlu0 %448 }
 0x107   : > { %v398_v57 = vmax.f32 %v388_v53, 0.0 }
 0x108   : > { %v399_v59 = vmax.f32 %v390_v55, 0.0 }
 0x109   : > { %v807_v60 = vpack.c.bf16 %v398_v57, %v396_v56 }
 0x10a   : > { %v805_v61 = vpack.c.bf16 %v399_v59, %v397_v58 }
 0x10c   : > { %806 = vmatprep.subr.bf16.mxu0 %v805_v61  ;;  %810 = vmatprep.subr.bf16.mxu1 %v805_v61 }
 0x10d   : > { %808 = vmatpush1.bf16.msra.mxu0 %v807_v60  ;;  %812 = vmatpush1.bf16.msra.mxu1 %v807_v60 }
 0x110   : > { %778 = vmatmul.mubr.msk.f32.vlgmr.msra.gmra.mrb[8].mxu0 %vm290_vm0, %v400_v62  ;;  %780 = vmatmul.mubr.msk.f32.vlgmr.msra.gmra.mrb[0].mxu1 %vm290_vm0, %v402_v63 }
 0x111   : > { %550 = vmatprep.mubr.f32.mxu0 %v958_v0  ;;  %562 = vmatprep.mubr.f32.mxu1 %v958_v0 }
 0x114   : > { %779 = vmatmul.mubr.msk.f32.gmra.mrb[10].mxu0 %vm290_vm0, %v401_v1  ;;  %781 = vmatmul.mubr.msk.f32.gmra.mrb[2].mxu1 %vm290_vm0, %v403_v2  ;;  %v454_v1 = vpop.permute.xlu1 %453 }
 0x115   : > { %568 = vmatprep.mubr.f32.mxu1 %v958_v0 }
 0x118   : > { %782 = vmatmul.mubr.msk.f32.gmra.mrb[4].mxu1 %vm290_vm0, %v404_v3 }
 0x119   : > { %574 = vmatprep.mubr.f32.mxu1 %v958_v0 }
 0x11c   : > { %783 = vmatmul.mubr.msk.f32.gmra.mrb[6].mxu1 %vm290_vm0, %v405_v4 }
 0x11d   : > { %580 = vmatprep.mubr.f32.mxu1 %v958_v0 }
 0x120   : > { %784 = vmatmul.mubr.msk.f32.gmra.mrb[8].mxu1 %vm290_vm0, %v406_v5 }
 0x121   : > { %586 = vmatprep.mubr.f32.mxu1 %v958_v0 }
 0x124   : > { %785 = vmatmul.mubr.msk.f32.gmra.mrb[10].mxu1 %vm290_vm0, %v407_v6 }
 0x1e3   : > { %v546_v9 = vpop.f32.mrb[8].mxu0  ;;  %v558_v10 = vpop.f32.mrb[0].mxu1 }
 0x1e4   : > { %v548_v11 = vpop.f32.mrb[9].mxu0  ;;  %v560_v12 = vpop.f32.mrb[1].mxu1  ;;  %v1149_v14 = vadd.f32 %v546_v9, %v419_v7  ;;  %v1153_v0 = vadd.f32 %v558_v10, %v429_v13 }
 0x1e5   : > { %v1151_v15 = vadd.f32 %v548_v11, %v419_v7  ;;  %v1157_v22 = vadd.f32 %v560_v12, %v429_v13 }
 0x1e6   : > { %v593_v24 = vmul.f32 %v1149_v14, %v1149_v14  ;;  %v597_v32 = vmul.f32 %v1153_v0, %v1153_v0 }
 0x1e7   : > { %v552_v16 = vpop.f32.mrb[10].mxu0  ;;  %v564_v17 = vpop.f32.mrb[2].mxu1  ;;  %v594_v28 = vmul.f32 %v1151_v15, %v1151_v15  ;;  %v598_v36 = vmul.f32 %v1157_v22, %v1157_v22 }
 0x1e8   : > { %v1155_v18 = vadd.f32 %v552_v16, %v424_v8  ;;  %v554_v19 = vpop.f32.mrb[11].mxu0  ;;  %v566_v20 = vpop.f32.mrb[3].mxu1  ;;  %v1165_v26 = vadd.f32 %v564_v17, %v434_v21 }
 0x1e9   : > { %v1159_v23 = vadd.f32 %v554_v19, %v424_v8  ;;  %v1171_v30 = vadd.f32 %v566_v20, %v434_v21 }
 0x1ea   : > { %v595_v25 = vmul.f32 %v1155_v18, %v1155_v18  ;;  %v599_v39 = vmul.f32 %v1165_v26, %v1165_v26 }
 0x1eb   : > { %v596_v29 = vmul.f32 %v1159_v23, %v1159_v23  ;;  %v570_v31 = vpop.f32.mrb[4].mxu1  ;;  %v600_v42 = vmul.f32 %v1171_v30, %v1171_v30 }
 0x1ec   : > { %v609_v33 = vadd.f32 %v595_v25, %v593_v24  ;;  %v1175_v34 = vadd.f32 %v570_v31, %v439_v27  ;;  %v572_v35 = vpop.f32.mrb[5].mxu1 }
 0x1ed   : > { %v622_v37 = vadd.f32 %v596_v29, %v594_v28  ;;  %v1179_v38 = vadd.f32 %v572_v35, %v439_v27 }
 0x1ee   : > { %v610_v40 = vadd.f32 %v609_v33, %v597_v32  ;;  %v601_v46 = vmul.f32 %v1175_v34, %v1175_v34 }
 0x1ef   : > { %v623_v43 = vadd.f32 %v622_v37, %v598_v36  ;;  %v576_v44 = vpop.f32.mrb[6].mxu1  ;;  %v602_v50 = vmul.f32 %v1179_v38, %v1179_v38 }
 0x1f0   : > { %v611_v45 = vadd.f32 %v610_v40, %v599_v39  ;;  %v1187_v47 = vadd.f32 %v576_v44, %v444_v41  ;;  %v578_v48 = vpop.f32.mrb[7].mxu1 }
 0x1f1   : > { %v624_v49 = vadd.f32 %v623_v43, %v600_v42  ;;  %v1191_v51 = vadd.f32 %v578_v48, %v444_v41 }
 0x1f2   : > { %v612_v52 = vadd.f32 %v611_v45, %v601_v46  ;;  %v603_v53 = vmul.f32 %v1187_v47, %v1187_v47 }
 0x1f3   : > { %v625_v55 = vadd.f32 %v624_v49, %v602_v50  ;;  %v604_v56 = vmul.f32 %v1191_v51, %v1191_v51  ;;  %v582_v57 = vpop.f32.mrb[8].mxu1 }
 0x1f4   : > { %v613_v58 = vadd.f32 %v612_v52, %v603_v53  ;;  %v583_v59 = vadd.f32 %v582_v57, %v449_v54  ;;  %v584_v60 = vpop.f32.mrb[9].mxu1 }
 0x1f5   : > { %v626_v61 = vadd.f32 %v625_v55, %v604_v56  ;;  %v585_v62 = vadd.f32 %v584_v60, %v449_v54 }
 0x1f6   : > { %v605_v63 = vmul.f32 %v583_v59, %v583_v59 }
 0x1f7   : > { %v606_v2 = vmul.f32 %v585_v62, %v585_v62  ;;  %v588_v3 = vpop.f32.mrb[10].mxu1 }
 0x1f8   : > { %v614_v4 = vadd.f32 %v613_v58, %v605_v63  ;;  %v589_v5 = vadd.f32 %v588_v3, %v454_v1  ;;  %v590_v6 = vpop.f32.mrb[11].mxu1 }
 0x1f9   : > { %v627_v7 = vadd.f32 %v626_v61, %v606_v2  ;;  %v591_v8 = vadd.f32 %v590_v6, %v454_v1 }
 0x1fa   : > { %v607_v9 = vmul.f32 %v589_v5, %v589_v5 }
 0x1fb   : > { %v608_v10 = vmul.f32 %v591_v8, %v591_v8 }
 0x1fc   : > { %v615_v11 = vadd.f32 %v614_v4, %v607_v9 }
 0x1fd   : > { %v628_v12 = vadd.f32 %v627_v7, %v608_v10 }
 0x1fe   : > { %v616_v13 = vrot.slane %v615_v11, 4 }
 0x1ff   : > { %v629_v16 = vrot.slane %v628_v12, 4 }
 0x200   : > { %v617_v17 = vadd.f32 %v616_v13, %v615_v11 }
 0x201   : > { %v630_v19 = vadd.f32 %v629_v16, %v628_v12 }
 0x202   : > { %v618_v20 = vrot.slane %v617_v17, 2 }
 0x203   : > { %v631_v21 = vrot.slane %v630_v19, 2 }
 0x204   : > { %v619_v24 = vadd.f32 %v618_v20, %v617_v17 }
 0x205   : > { %v632_v25 = vadd.f32 %v631_v21, %v630_v19 }
 0x206   : > { %v620_v27 = vrot.slane %v619_v24, 1 }
 0x207   : > { %v633_v28 = vrot.slane %v632_v25, 1 }
 0x208   : > { %v621_v29 = vadd.f32 %v620_v27, %v619_v24 }
 0x209   : > { %v634_v31 = vadd.f32 %v633_v28, %v632_v25 }
 0x20a   : > { %v635_v32 = vmax.f32 %v621_v29, 1e-24 }
 0x20b   : > { %v636_v33 = vmax.f32 %v634_v31, 1e-24 }
 0x20c   : > { %874 = vrsqrt.f32 %v635_v32 }
 0x20d   : > { %876 = vrsqrt.f32 %v636_v33 }
 0x216   : > { %v875_v35 = vpop.eup %874 }
 0x217   : > { %v877_v36 = vpop.eup %876  ;;  %v653_v37 = vmul.f32 %v875_v35, %v589_v5  ;;  %v639_v39 = vmul.f32 %v875_v35, %v1149_v14  ;;  %v641_v40 = vmul.f32 %v875_v35, %v1155_v18  ;;  %v643_v41 = vmul.f32 %v875_v35, %v1153_v0 }
 0x218   : > { %v654_v42 = vmul.f32 %v877_v36, %v591_v8  ;;  %v640_v43 = vmul.f32 %v877_v36, %v1151_v15  ;;  %v642_v44 = vmul.f32 %v877_v36, %v1159_v23  ;;  %v644_v45 = vmul.f32 %v877_v36, %v1157_v22 }
 0x219   : > { %669 = vst [vmem:[%s1201_s24 + $0x70] sm:$0xff] %v653_v37  ;;  %v645_v46 = vmul.f32 %v875_v35, %v1165_v26  ;;  %v646_v14 = vmul.f32 %v877_v36, %v1171_v30  ;;  %v647_v18 = vmul.f32 %v875_v35, %v1175_v34  ;;  %v648_v0 = vmul.f32 %v877_v36, %v1179_v38 }
 0x21a   : > { %655 = vst [vmem:[%s1201_s24] sm:$0xff] %v639_v39  ;;  %657 = vst [vmem:[%s1201_s24 + $0x10] sm:$0xff] %v641_v40  ;;  %v649_v15 = vmul.f32 %v875_v35, %v1187_v47  ;;  %v650_v22 = vmul.f32 %v877_v36, %v1191_v51  ;;  %v651_v23 = vmul.f32 %v875_v35, %v583_v59 }
 0x21b   : > { %659 = vst [vmem:[%s1201_s24 + $0x20] sm:$0xff] %v643_v41  ;;  %670 = vst [vmem:[%s1201_s24 + $0x78] sm:$0xff] %v654_v42  ;;  %v652_v26 = vmul.f32 %v877_v36, %v585_v62 }
 0x21c   : > { %656 = vst [vmem:[%s1201_s24 + $0x8] sm:$0xff] %v640_v43  ;;  %658 = vst [vmem:[%s1201_s24 + $0x18] sm:$0xff] %v642_v44 }
 0x21d   : > { %660 = vst [vmem:[%s1201_s24 + $0x28] sm:$0xff] %v644_v45  ;;  %661 = vst [vmem:[%s1201_s24 + $0x30] sm:$0xff] %v645_v46 }
 0x21e   : > { %662 = vst [vmem:[%s1201_s24 + $0x38] sm:$0xff] %v646_v14  ;;  %663 = vst [vmem:[%s1201_s24 + $0x40] sm:$0xff] %v647_v18 }
 0x21f   : > { %664 = vst [vmem:[%s1201_s24 + $0x48] sm:$0xff] %v648_v0  ;;  %665 = vst [vmem:[%s1201_s24 + $0x50] sm:$0xff] %v649_v15 }
 0x220   : > { %666 = vst [vmem:[%s1201_s24 + $0x58] sm:$0xff] %v650_v22  ;;  %667 = vst [vmem:[%s1201_s24 + $0x60] sm:$0xff] %v651_v23 }
 0x221   : > { %668 = vst [vmem:[%s1201_s24 + $0x68] sm:$0xff] %v652_v26 }
 0x222   : > { %891 = shalt.err (!%p888_p5)
}
 0x223   : > { %s892_s12 = scalar_lea.hbm %s1221_s29, 2048  ;;  %s896_s15 = scalar_lea.hbm %s1292_s5, 4096 }
 0x224   : > { %p893_p6 = scmp.ne.s32.totalorder %s1221_s29, %s892_s12  ;;  %p897_p10 = scmp.lt.u32.totalorder %s1221_s29, %s1292_s5 }
 0x225   : > { %p898_p11 = scmp.lt.u32.totalorder %s896_s15, %s892_s12  ;;  %p900_p13 = scmp.lt.u32.totalorder %s892_s12, %s1221_s29 }
 0x226   : > { %p894_p7 = pnand %p893_p6, %p1033_p4 }
 0x227   : > { %p899_p12 = por %p898_p11, %p897_p10 }
 0x228   : > { %p895_p9 = pneg %p894_p7 }
 0x229   : > { %p901_p0 = por %p900_p13, %p899_p12 }
 0x22b   : > { %p902_p1 = pnand %p901_p0, %p895_p9 }
 0x22d   : > { %905 = shalt.err (!%p902_p1)
}
 0x22e   : > { %s961_s24 = smov 256   ;;  %s962_s21 = smov 16  }
 0x22f   : > { %813 = dma.vmem_to_hbm [thread:$0]  (%p1033_p4), %s1223_s25, 2048, %s1221_s29, %s1241_s7, %s961_s24, %s961_s24, %s962_s21  }
 0x230 PF: > { %p819_p2 = scmp.ge.s32.totalorder %s956_s23, 2  ;;  %s702_s27 = sand.u32 1, %s936_s18  }
 0x231   : > { %s703_s8 = scalar_lea.sflag [#allocation3], %s702_s27 }
 0x232   : > { %p816_p3 = pnand %p819_p2, %p1040_p8 }
 0x234   : > { %931 = dma.done.wait (!%p816_p3), %s703_s8, 2048  }
 0x235   : > { %933 = vsyncadd (!%p816_p3), %s703_s8, 4294965248  ;;  %s18_s23 = sadd.s32 1, %s956_s23   ;;  %s1295_s18 = smov %s940_s19 }
 0x236   : > { %p15_p5 = scmp.ge.s32.totalorder %s18_s23, 4   ;;  %s1296_s19 = smov %s944_s20 }
 0x237   : > { %s1297_s20 = smov %s1046_s6  ;;  %s1298_s21 = smov %s952_s22 }
 0x238   : > { %s1299_s22 = smov %s1301_s26  ;;  %17 = sbr.rel (!%p15_p5) target bundleno = 4 (0x4), region = 75 }
 0x23f   :  { %708 = vsyncpa [#allocation3], 1 }
 0x240   :  { %710 = vsyncpa [#allocation3 + $0x1], 1 }

// kernel: tpu_custom_call.1
= control target key start
LH: loop header
LB: loop body
LE: loop exit
PB: predicated region body
PF: predicated region fallthrough
CT: control target
= control target key end

     0   :  { %10 = vsyncpa [#allocation3], 0  ;;  %s1287_s0 = inlined_call_operand.vmem [shape: f32[2,32,256], index: 0, kind: input, shape index: {}]   ;;  %s1288_s1 = inlined_call_operand.vmem [shape: f32[32,32], index: 1, kind: input, shape index: {}]   ;;  %s1289_s2 = inlined_call_operand.vmem [shape: f32[32,1], index: 2, kind: input, shape index: {}]   ;;  %s1290_s3 = inlined_call_operand.vmem [shape: f32[64,32], index: 3, kind: input, shape index: {}]   ;;  %s1291_s4 = inlined_call_operand.vmem [shape: f32[64,1], index: 4, kind: input, shape index: {}]   ;;  %s1292_s5 = inlined_call_operand.hbm [shape: f32[2,64,256], index: 5, kind: output, shape index: {}]  }
   0x1   :  { %12 = vsyncpa [#allocation3 + $0x1], 0  ;;  %s993_s18 = smov 0   ;;  %s995_s19 = smov 0  }
   0x2   :  { %s997_s20 = smov 0   ;;  %s999_s21 = smov 0  }
   0x3   :  { %s1001_s22 = smov 0   ;;  %s1003_s23 = smov 0  }
   0x4 LB: > { %s766_s24 = sadd.s32 4294967295, %s956_s23   ;;  %s767_s25 = sadd.s32 4294967294, %s956_s23   ;;  %s956_s23 = sphi %s1003_s23, %s18_s23   ;;  %s952_s22 = sphi %s1001_s22, %s1299_s22   ;;  %s948_s21 = sphi %s999_s21, %s1298_s21   ;;  %s944_s20 = sphi %s997_s20, %s1297_s20   ;;  %s940_s19 = sphi %s995_s19, %s1296_s19   ;;  %s936_s18 = sphi %s993_s18, %s1295_s18  }
   0x5   : > { %s30_s26 = sadd.s32 1, %s952_s22  ;;  %s151_s27 = sadd.s32 1, %s944_s20 }
   0x6   : > { %p32_p0 = scmp.ge.s32.totalorder %s30_s26, 2  ;;  %p161_p1 = scmp.ne.s32.totalorder %s944_s20, %s940_s19 }
   0x7   : > { %p162_p2 = scmp.eq.s32.totalorder %s766_s24, 1  ;;  %p167_p3 = scmp.ne.s32.totalorder %s940_s19, %s936_s18 }
   0x8   : > { %s1301_s26 = smov (%p32_p0, %s30_s26), 0  ;;  %p168_p5 = scmp.eq.s32.totalorder %s767_s25, 1 }
   0x9   : > { %p1033_p4 = por %p162_p2, %p161_p1  ;;  %s146_s29 = ssub.s32 %s952_s22, %s1301_s26 }
   0xa   : > { %p770_p6 = scmp.ge.s32.totalorder %s956_s23, 1  ;;  %p149_p7 = scmp.eq.s32.totalorder %s146_s29, 0 }
   0xb   : > { %p1040_p8 = por %p168_p5, %p167_p3  ;;  %p211_p9 = scmp.lt.s32.totalorder %s956_s23, 3 }
   0xc   : > { %s1046_s6 = scalar_select %p149_p7, %s944_s20, %s151_s27  }
   0xd   : > { %p212_p10 = pnand %p770_p6, %p211_p9 }
   0xe   : > { %p244_p11 = scmp.lt.s32.totalorder (!%p212_p10), %s948_s21, 1  ;;  %v958_v0 = vmov (!%p212_p10), 0.0   ;;  %v266_v1 = vld [vmem:[%s1289_s2] sm:$0xff] (!%p212_p10)  ;;  %v959_v2 = vmov (!%p212_p10), 0   ;;  %v268_v3 = vld [vmem:[%s1289_s2 + $0x10] sm:$0xff] (!%p212_p10)  ;;  %v267_v4 = vld [vmem:[%s1289_s2 + $0x8] sm:$0xff] (!%p212_p10) }
   0xf   : > { %215 = sbr.rel (%p212_p10) target bundleno = 560 (0x230), region = 40  ;;  %367 = vmatprep.mubr.f32.mxu0 (!%p212_p10), %v958_v0  ;;  %556 = vmatprep.mubr.f32.mxu1 (!%p212_p10), %v958_v0  ;;  %v269_v5 = vld [vmem:[%s1289_s2 + $0x18] sm:$0xff] (!%p212_p10)  ;;  %v408_v17 = vld [vmem:[%s1291_s4] sm:$0xff] (!%p212_p10)  ;;  %v409_v18 = vld [vmem:[%s1291_s4 + $0x8] sm:$0xff] (!%p212_p10)  ;;  %vm290_vm0 = vcmask (!%p212_p10), 261120   ;;  %s240_s15 = sand.u32 (!%p212_p10), 1, %s940_s19  }
  0x10   : > { %872 = vset.pattern.permute.xlu0 (!%p212_p10), %v959_v2  ;;  %873 = vset.pattern.permute.xlu1 (!%p212_p10), %v959_v2  ;;  %v410_v20 = vld [vmem:[%s1291_s4 + $0x10] sm:$0xff] (!%p212_p10)  ;;  %v411_v21 = vld [vmem:[%s1291_s4 + $0x18] sm:$0xff] (!%p212_p10)  ;;  %v262_v22 = vld [vmem:[%s1288_s1] sm:$0xff] (!%p212_p10)  ;;  %s771_s16 = sshll.u32 (!%p212_p10), %s240_s15, 7  ;;  %s792_s17 = sshll.u32 (!%p212_p10), %s948_s21, 11 }
  0x11   : > { %272 = vperm.xlu0 (!%p212_p10), %872, %v266_v1   ;;  %282 = vperm.xlu1 (!%p212_p10), %873, %v268_v3   ;;  %v412_v23 = vld [vmem:[%s1291_s4 + $0x20] sm:$0xff] (!%p212_p10)  ;;  %v413_v24 = vld [vmem:[%s1291_s4 + $0x28] sm:$0xff] (!%p212_p10)  ;;  %v414_v26 = vld [vmem:[%s1291_s4 + $0x30] sm:$0xff] (!%p212_p10)  ;;  %s1201_s24 = scalar_lea.vmem (!%p212_p10), [#allocation2], %s771_s16  ;;  %s1221_s29 = scalar_lea.hbm (!%p212_p10), %s1292_s5, %s792_s17 }
  0x12   : > { %v263_v25 = vld [vmem:[%s1288_s1 + $0x8] sm:$0xff] (!%p212_p10)  ;;  %v415_v27 = vld [vmem:[%s1291_s4 + $0x38] sm:$0xff] (!%p212_p10)  ;;  %v264_v28 = vld [vmem:[%s1288_s1 + $0x10] sm:$0xff] (!%p212_p10)  ;;  %s1241_s7 = scalar_lea.sflag (!%p212_p10), [#allocation3], %s240_s15 }
  0x13   : > { %v265_v29 = vld [vmem:[%s1288_s1 + $0x18] sm:$0xff] (!%p212_p10)  ;;  %v400_v62 = vld [vmem:[%s1290_s3] sm:$0xff] (!%p212_p10)  ;;  %v402_v63 = vld [vmem:[%s1290_s3 + $0x10] sm:$0xff] (!%p212_p10) }
  0x14   : > { %v401_v1 = vld [vmem:[%s1290_s3 + $0x8] sm:$0xff] (!%p212_p10)  ;;  %v403_v2 = vld [vmem:[%s1290_s3 + $0x18] sm:$0xff] (!%p212_p10)  ;;  %v404_v3 = vld [vmem:[%s1290_s3 + $0x20] sm:$0xff] (!%p212_p10) }
  0x15   : > { %277 = vperm.xlu0 (!%p212_p10), %872, %v267_v4   ;;  %287 = vperm.xlu1 (!%p212_p10), %873, %v269_v5   ;;  %v405_v4 = vld [vmem:[%s1290_s3 + $0x28] sm:$0xff] (!%p212_p10)  ;;  %v406_v5 = vld [vmem:[%s1290_s3 + $0x30] sm:$0xff] (!%p212_p10) }
  0x16   : > { %s245_s9 = scalar_select %p244_p11, %s948_s21, 1 }
  0x18   : > { %s791_s12 = sshll.u32 %s245_s9, 6  ;;  %s960_s9 = smov [#allocation2]  }
  0x19   : > { %s251_s25 = scalar_lea.vmem %s1287_s0, %s791_s12  ;;  %418 = vperm.xlu0 %872, %v408_v17   ;;  %423 = vperm.xlu1 %873, %v409_v18   ;;  %s882_s10 = sshll.u32 %s960_s9, 4  ;;  %s883_s10 = int_to_ptr.vmem [resolvable:$false] %s882_s10 }
  0x1a   : > { %v255_v6 = vld [vmem:[%s251_s25 + $0x8] sm:$0xff]  ;;  %v257_v7 = vld [vmem:[%s251_s25 + $0x18] sm:$0xff]  ;;  %v254_v8 = vld [vmem:[%s251_s25] sm:$0xff]  ;;  %s884_s11 = scalar_lea.vmem %s883_s10, 4096 }
  0x1b   : > { %v793_v9 = vpack.c.bf16 %v257_v7, %v255_v6  ;;  %v256_v10 = vld [vmem:[%s251_s25 + $0x10] sm:$0xff]  ;;  %v259_v11 = vld [vmem:[%s251_s25 + $0x28] sm:$0xff]  ;;  %v261_v12 = vld [vmem:[%s251_s25 + $0x38] sm:$0xff] }
  0x1c   : > { %v795_v13 = vpack.c.bf16 %v256_v10, %v254_v8  ;;  %v797_v14 = vpack.c.bf16 %v261_v12, %v259_v11  ;;  %v258_v15 = vld [vmem:[%s251_s25 + $0x20] sm:$0xff]  ;;  %v260_v16 = vld [vmem:[%s251_s25 + $0x30] sm:$0xff]  ;;  %v407_v6 = vld [vmem:[%s1290_s3 + $0x38] sm:$0xff]  ;;  %s687_s25 = sshll.u32 %s1201_s24, 4  ;;  %s1223_s25 = int_to_ptr.vmem [resolvable:$true] %s687_s25 }
  0x1d   : > { %794 = vmatprep.subr.bf16.mxu0 %v793_v9  ;;  %v799_v19 = vpack.c.bf16 %v260_v16, %v258_v15  ;;  %428 = vperm.xlu0 %872, %v410_v20   ;;  %s878_s8 = scalar_lea.vmem %s1223_s25, 2048  ;;  %p885_p1 = scmp.lt.s32.totalorder %s1223_s25, %s883_s10 }
  0x1e   : > { %796 = vmatpush1.bf16.msra.mxu0 %v795_v13  ;;  %433 = vperm.xlu1 %873, %v411_v21   ;;  %p879_p12 = scmp.ne.s32.totalorder %s1223_s25, %s878_s8  ;;  %p886_p2 = scmp.lt.s32.totalorder %s884_s11, %s878_s8 }
  0x1f   : > { %798 = vmatprep.subr.bf16.mxu0 %v797_v14 }
  0x20   : > { %p880_p13 = pnand %p879_p12, %p1033_p4  ;;  %p887_p3 = por %p886_p2, %p885_p1 }
  0x21   : > { %438 = vperm.xlu0 %872, %v412_v23  }
  0x22   : > { %800 = vmatpush1.bf16.msra.mxu0 %v799_v19  ;;  %443 = vperm.xlu1 %873, %v413_v24   ;;  %p881_p0 = pneg %p880_p13 }
  0x24   : > { %p888_p5 = pnand %p887_p3, %p881_p0 }
  0x25   : > { %774 = vmatmul.mubr.msk.f32.vlgmr.msra.gmra.mrb[0].mxu0 %vm290_vm0, %v262_v22  ;;  %448 = vperm.xlu0 %872, %v414_v26  }
  0x26   : > { %373 = vmatprep.mubr.f32.mxu0 %v958_v0  ;;  %453 = vperm.xlu1 %873, %v415_v27  }
  0x29   : > { %775 = vmatmul.mubr.msk.f32.gmra.mrb[2].mxu0 %vm290_vm0, %v263_v25 }
  0x2a   : > { %379 = vmatprep.mubr.f32.mxu0 %v958_v0 }
  0x2d   : > { %776 = vmatmul.mubr.msk.f32.gmra.mrb[4].mxu0 %vm290_vm0, %v264_v28 }
  0x2e   : > { %385 = vmatprep.mubr.f32.mxu0 %v958_v0 }
  0x31   : > { %777 = vmatmul.mubr.msk.f32.gmra.mrb[6].mxu0 %vm290_vm0, %v265_v29 }
  0x32   : > { %544 = vmatprep.mubr.f32.mxu0 %v958_v0 }
  0x90   : > { %v273_v30 = vpop.permute.xlu0 %272  ;;  %v283_v39 = vpop.permute.xlu1 %282 }
  0x94   : > { %v278_v34 = vpop.permute.xlu0 %277  ;;  %v288_v50 = vpop.permute.xlu1 %287 }
  0x98   : > { %v419_v7 = vpop.permute.xlu0 %418  ;;  %v424_v8 = vpop.permute.xlu1 %423 }
  0x9c   : > { %v429_v13 = vpop.permute.xlu0 %428 }
  0x9d   : > { %v434_v21 = vpop.permute.xlu1 %433 }
  0xa0   : > { %v439_v27 = vpop.permute.xlu0 %438 }
  0xf8   : > { %v369_v31 = vpop.f32.mrb[0].mxu0 }
  0xf9   : > { %v371_v32 = vpop.f32.mrb[1].mxu0  ;;  %v370_v33 = vadd.f32 %v369_v31, %v273_v30 }
  0xfa   : > { %v372_v35 = vadd.f32 %v371_v32, %v273_v30 }
  0xfb   : > { %v392_v41 = vmax.f32 %v370_v33, 0.0 }
  0xfc   : > { %v375_v36 = vpop.f32.mrb[2].mxu0  ;;  %v393_v43 = vmax.f32 %v372_v35, 0.0 }
  0xfd   : > { %v376_v37 = vadd.f32 %v375_v36, %v278_v34  ;;  %v377_v38 = vpop.f32.mrb[3].mxu0 }
  0xfe   : > { %v378_v40 = vadd.f32 %v377_v38, %v278_v34 }
  0xff   : > { %v394_v42 = vmax.f32 %v376_v37, 0.0 }
 0x100   : > { %v395_v44 = vmax.f32 %v378_v40, 0.0  ;;  %v381_v45 = vpop.f32.mrb[4].mxu0 }
 0x101   : > { %v803_v46 = vpack.c.bf16 %v394_v42, %v392_v41  ;;  %v383_v47 = vpop.f32.mrb[5].mxu0  ;;  %v382_v49 = vadd.f32 %v381_v45, %v283_v39  ;;  %v444_v41 = vpop.permute.xlu1 %443 }
 0x102   : > { %v801_v48 = vpack.c.bf16 %v395_v44, %v393_v43  ;;  %v384_v51 = vadd.f32 %v383_v47, %v283_v39 }
 0x103   : > { %v396_v56 = vmax.f32 %v382_v49, 0.0 }
 0x104   : > { %v387_v52 = vpop.f32.mrb[6].mxu0  ;;  %802 = vmatprep.subr.bf16.mxu0 %v801_v48  ;;  %809 = vmatprep.subr.bf16.mxu1 %v801_v48  ;;  %v397_v58 = vmax.f32 %v384_v51, 0.0 }
 0x105   : > { %v388_v53 = vadd.f32 %v387_v52, %v288_v50  ;;  %v389_v54 = vpop.f32.mrb[7].mxu0  ;;  %804 = vmatpush1.bf16.msra.mxu0 %v803_v46  ;;  %811 = vmatpush1.bf16.msra.mxu1 %v803_v46 }
 0x106   : > { %v390_v55 = vadd.f32 %v389_v54, %v288_v50  ;;  %v449_v54 = vpop.permute.xlu0 %448 }
 0x107   : > { %v398_v57 = vmax.f32 %v388_v53, 0.0 }
 0x108   : > { %v399_v59 = vmax.f32 %v390_v55, 0.0 }
 0x109   : > { %v807_v60 = vpack.c.bf16 %v398_v57, %v396_v56 }
 0x10a   : > { %v805_v61 = vpack.c.bf16 %v399_v59, %v397_v58 }
 0x10c   : > { %806 = vmatprep.subr.bf16.mxu0 %v805_v61  ;;  %810 = vmatprep.subr.bf16.mxu1 %v805_v61 }
 0x10d   : > { %808 = vmatpush1.bf16.msra.mxu0 %v807_v60  ;;  %812 = vmatpush1.bf16.msra.mxu1 %v807_v60 }
 0x110   : > { %778 = vmatmul.mubr.msk.f32.vlgmr.msra.gmra.mrb[8].mxu0 %vm290_vm0, %v400_v62  ;;  %780 = vmatmul.mubr.msk.f32.vlgmr.msra.gmra.mrb[0].mxu1 %vm290_vm0, %v402_v63 }
 0x111   : > { %550 = vmatprep.mubr.f32.mxu0 %v958_v0  ;;  %562 = vmatprep.mubr.f32.mxu1 %v958_v0 }
 0x114   : > { %779 = vmatmul.mubr.msk.f32.gmra.mrb[10].mxu0 %vm290_vm0, %v401_v1  ;;  %781 = vmatmul.mubr.msk.f32.gmra.mrb[2].mxu1 %vm290_vm0, %v403_v2  ;;  %v454_v1 = vpop.permute.xlu1 %453 }
 0x115   : > { %568 = vmatprep.mubr.f32.mxu1 %v958_v0 }
 0x118   : > { %782 = vmatmul.mubr.msk.f32.gmra.mrb[4].mxu1 %vm290_vm0, %v404_v3 }
 0x119   : > { %574 = vmatprep.mubr.f32.mxu1 %v958_v0 }
 0x11c   : > { %783 = vmatmul.mubr.msk.f32.gmra.mrb[6].mxu1 %vm290_vm0, %v405_v4 }
 0x11d   : > { %580 = vmatprep.mubr.f32.mxu1 %v958_v0 }
 0x120   : > { %784 = vmatmul.mubr.msk.f32.gmra.mrb[8].mxu1 %vm290_vm0, %v406_v5 }
 0x121   : > { %586 = vmatprep.mubr.f32.mxu1 %v958_v0 }
 0x124   : > { %785 = vmatmul.mubr.msk.f32.gmra.mrb[10].mxu1 %vm290_vm0, %v407_v6 }
 0x1e3   : > { %v546_v9 = vpop.f32.mrb[8].mxu0  ;;  %v558_v10 = vpop.f32.mrb[0].mxu1 }
 0x1e4   : > { %v548_v11 = vpop.f32.mrb[9].mxu0  ;;  %v560_v12 = vpop.f32.mrb[1].mxu1  ;;  %v1149_v14 = vadd.f32 %v546_v9, %v419_v7  ;;  %v1153_v0 = vadd.f32 %v558_v10, %v429_v13 }
 0x1e5   : > { %v1151_v15 = vadd.f32 %v548_v11, %v419_v7  ;;  %v1157_v22 = vadd.f32 %v560_v12, %v429_v13 }
 0x1e6   : > { %v593_v24 = vmul.f32 %v1149_v14, %v1149_v14  ;;  %v597_v32 = vmul.f32 %v1153_v0, %v1153_v0 }
 0x1e7   : > { %v552_v16 = vpop.f32.mrb[10].mxu0  ;;  %v564_v17 = vpop.f32.mrb[2].mxu1  ;;  %v594_v28 = vmul.f32 %v1151_v15, %v1151_v15  ;;  %v598_v36 = vmul.f32 %v1157_v22, %v1157_v22 }
 0x1e8   : > { %v1155_v18 = vadd.f32 %v552_v16, %v424_v8  ;;  %v554_v19 = vpop.f32.mrb[11].mxu0  ;;  %v566_v20 = vpop.f32.mrb[3].mxu1  ;;  %v1165_v26 = vadd.f32 %v564_v17, %v434_v21 }
 0x1e9   : > { %v1159_v23 = vadd.f32 %v554_v19, %v424_v8  ;;  %v1171_v30 = vadd.f32 %v566_v20, %v434_v21 }
 0x1ea   : > { %v595_v25 = vmul.f32 %v1155_v18, %v1155_v18  ;;  %v599_v39 = vmul.f32 %v1165_v26, %v1165_v26 }
 0x1eb   : > { %v596_v29 = vmul.f32 %v1159_v23, %v1159_v23  ;;  %v570_v31 = vpop.f32.mrb[4].mxu1  ;;  %v600_v42 = vmul.f32 %v1171_v30, %v1171_v30 }
 0x1ec   : > { %v609_v33 = vadd.f32 %v595_v25, %v593_v24  ;;  %v1175_v34 = vadd.f32 %v570_v31, %v439_v27  ;;  %v572_v35 = vpop.f32.mrb[5].mxu1 }
 0x1ed   : > { %v622_v37 = vadd.f32 %v596_v29, %v594_v28  ;;  %v1179_v38 = vadd.f32 %v572_v35, %v439_v27 }
 0x1ee   : > { %v610_v40 = vadd.f32 %v609_v33, %v597_v32  ;;  %v601_v46 = vmul.f32 %v1175_v34, %v1175_v34 }
 0x1ef   : > { %v623_v43 = vadd.f32 %v622_v37, %v598_v36  ;;  %v576_v44 = vpop.f32.mrb[6].mxu1  ;;  %v602_v50 = vmul.f32 %v1179_v38, %v1179_v38 }
 0x1f0   : > { %v611_v45 = vadd.f32 %v610_v40, %v599_v39  ;;  %v1187_v47 = vadd.f32 %v576_v44, %v444_v41  ;;  %v578_v48 = vpop.f32.mrb[7].mxu1 }
 0x1f1   : > { %v624_v49 = vadd.f32 %v623_v43, %v600_v42  ;;  %v1191_v51 = vadd.f32 %v578_v48, %v444_v41 }
 0x1f2   : > { %v612_v52 = vadd.f32 %v611_v45, %v601_v46  ;;  %v603_v53 = vmul.f32 %v1187_v47, %v1187_v47 }
 0x1f3   : > { %v625_v55 = vadd.f32 %v624_v49, %v602_v50  ;;  %v604_v56 = vmul.f32 %v1191_v51, %v1191_v51  ;;  %v582_v57 = vpop.f32.mrb[8].mxu1 }
 0x1f4   : > { %v613_v58 = vadd.f32 %v612_v52, %v603_v53  ;;  %v583_v59 = vadd.f32 %v582_v57, %v449_v54  ;;  %v584_v60 = vpop.f32.mrb[9].mxu1 }
 0x1f5   : > { %v626_v61 = vadd.f32 %v625_v55, %v604_v56  ;;  %v585_v62 = vadd.f32 %v584_v60, %v449_v54 }
 0x1f6   : > { %v605_v63 = vmul.f32 %v583_v59, %v583_v59 }
 0x1f7   : > { %v606_v2 = vmul.f32 %v585_v62, %v585_v62  ;;  %v588_v3 = vpop.f32.mrb[10].mxu1 }
 0x1f8   : > { %v614_v4 = vadd.f32 %v613_v58, %v605_v63  ;;  %v589_v5 = vadd.f32 %v588_v3, %v454_v1  ;;  %v590_v6 = vpop.f32.mrb[11].mxu1 }
 0x1f9   : > { %v627_v7 = vadd.f32 %v626_v61, %v606_v2  ;;  %v591_v8 = vadd.f32 %v590_v6, %v454_v1 }
 0x1fa   : > { %v607_v9 = vmul.f32 %v589_v5, %v589_v5 }
 0x1fb   : > { %v608_v10 = vmul.f32 %v591_v8, %v591_v8 }
 0x1fc   : > { %v615_v11 = vadd.f32 %v614_v4, %v607_v9 }
 0x1fd   : > { %v628_v12 = vadd.f32 %v627_v7, %v608_v10 }
 0x1fe   : > { %v616_v13 = vrot.slane %v615_v11, 4 }
 0x1ff   : > { %v629_v16 = vrot.slane %v628_v12, 4 }
 0x200   : > { %v617_v17 = vadd.f32 %v616_v13, %v615_v11 }
 0x201   : > { %v630_v19 = vadd.f32 %v629_v16, %v628_v12 }
 0x202   : > { %v618_v20 = vrot.slane %v617_v17, 2 }
 0x203   : > { %v631_v21 = vrot.slane %v630_v19, 2 }
 0x204   : > { %v619_v24 = vadd.f32 %v618_v20, %v617_v17 }
 0x205   : > { %v632_v25 = vadd.f32 %v631_v21, %v630_v19 }
 0x206   : > { %v620_v27 = vrot.slane %v619_v24, 1 }
 0x207   : > { %v633_v28 = vrot.slane %v632_v25, 1 }
 0x208   : > { %v621_v29 = vadd.f32 %v620_v27, %v619_v24 }
 0x209   : > { %v634_v31 = vadd.f32 %v633_v28, %v632_v25 }
 0x20a   : > { %v635_v32 = vmax.f32 %v621_v29, 1e-24 }
 0x20b   : > { %v636_v33 = vmax.f32 %v634_v31, 1e-24 }
 0x20c   : > { %874 = vrsqrt.f32 %v635_v32 }
 0x20d   : > { %876 = vrsqrt.f32 %v636_v33 }
 0x216   : > { %v875_v35 = vpop.eup %874 }
 0x217   : > { %v877_v36 = vpop.eup %876  ;;  %v653_v37 = vmul.f32 %v875_v35, %v589_v5  ;;  %v639_v39 = vmul.f32 %v875_v35, %v1149_v14  ;;  %v641_v40 = vmul.f32 %v875_v35, %v1155_v18  ;;  %v643_v41 = vmul.f32 %v875_v35, %v1153_v0 }
 0x218   : > { %v654_v42 = vmul.f32 %v877_v36, %v591_v8  ;;  %v640_v43 = vmul.f32 %v877_v36, %v1151_v15  ;;  %v642_v44 = vmul.f32 %v877_v36, %v1159_v23  ;;  %v644_v45 = vmul.f32 %v877_v36, %v1157_v22 }
 0x219   : > { %669 = vst [vmem:[%s1201_s24 + $0x70] sm:$0xff] %v653_v37  ;;  %v645_v46 = vmul.f32 %v875_v35, %v1165_v26  ;;  %v646_v14 = vmul.f32 %v877_v36, %v1171_v30  ;;  %v647_v18 = vmul.f32 %v875_v35, %v1175_v34  ;;  %v648_v0 = vmul.f32 %v877_v36, %v1179_v38 }
 0x21a   : > { %655 = vst [vmem:[%s1201_s24] sm:$0xff] %v639_v39  ;;  %657 = vst [vmem:[%s1201_s24 + $0x10] sm:$0xff] %v641_v40  ;;  %v649_v15 = vmul.f32 %v875_v35, %v1187_v47  ;;  %v650_v22 = vmul.f32 %v877_v36, %v1191_v51  ;;  %v651_v23 = vmul.f32 %v875_v35, %v583_v59 }
 0x21b   : > { %659 = vst [vmem:[%s1201_s24 + $0x20] sm:$0xff] %v643_v41  ;;  %670 = vst [vmem:[%s1201_s24 + $0x78] sm:$0xff] %v654_v42  ;;  %v652_v26 = vmul.f32 %v877_v36, %v585_v62 }
 0x21c   : > { %656 = vst [vmem:[%s1201_s24 + $0x8] sm:$0xff] %v640_v43  ;;  %658 = vst [vmem:[%s1201_s24 + $0x18] sm:$0xff] %v642_v44 }
 0x21d   : > { %660 = vst [vmem:[%s1201_s24 + $0x28] sm:$0xff] %v644_v45  ;;  %661 = vst [vmem:[%s1201_s24 + $0x30] sm:$0xff] %v645_v46 }
 0x21e   : > { %662 = vst [vmem:[%s1201_s24 + $0x38] sm:$0xff] %v646_v14  ;;  %663 = vst [vmem:[%s1201_s24 + $0x40] sm:$0xff] %v647_v18 }
 0x21f   : > { %664 = vst [vmem:[%s1201_s24 + $0x48] sm:$0xff] %v648_v0  ;;  %665 = vst [vmem:[%s1201_s24 + $0x50] sm:$0xff] %v649_v15 }
 0x220   : > { %666 = vst [vmem:[%s1201_s24 + $0x58] sm:$0xff] %v650_v22  ;;  %667 = vst [vmem:[%s1201_s24 + $0x60] sm:$0xff] %v651_v23 }
 0x221   : > { %668 = vst [vmem:[%s1201_s24 + $0x68] sm:$0xff] %v652_v26 }
 0x222   : > { %891 = shalt.err (!%p888_p5)
}
 0x223   : > { %s892_s12 = scalar_lea.hbm %s1221_s29, 2048  ;;  %s896_s15 = scalar_lea.hbm %s1292_s5, 4096 }
 0x224   : > { %p893_p6 = scmp.ne.s32.totalorder %s1221_s29, %s892_s12  ;;  %p897_p10 = scmp.lt.u32.totalorder %s1221_s29, %s1292_s5 }
 0x225   : > { %p898_p11 = scmp.lt.u32.totalorder %s896_s15, %s892_s12  ;;  %p900_p13 = scmp.lt.u32.totalorder %s892_s12, %s1221_s29 }
 0x226   : > { %p894_p7 = pnand %p893_p6, %p1033_p4 }
 0x227   : > { %p899_p12 = por %p898_p11, %p897_p10 }
 0x228   : > { %p895_p9 = pneg %p894_p7 }
 0x229   : > { %p901_p0 = por %p900_p13, %p899_p12 }
 0x22b   : > { %p902_p1 = pnand %p901_p0, %p895_p9 }
 0x22d   : > { %905 = shalt.err (!%p902_p1)
}
 0x22e   : > { %s961_s24 = smov 256   ;;  %s962_s21 = smov 16  }
 0x22f   : > { %813 = dma.vmem_to_hbm [thread:$0]  (%p1033_p4), %s1223_s25, 2048, %s1221_s29, %s1241_s7, %s961_s24, %s961_s24, %s962_s21  }
 0x230 PF: > { %p819_p2 = scmp.ge.s32.totalorder %s956_s23, 2  ;;  %s702_s27 = sand.u32 1, %s936_s18  }
 0x231   : > { %s703_s8 = scalar_lea.sflag [#allocation3], %s702_s27 }
 0x232   : > { %p816_p3 = pnand %p819_p2, %p1040_p8 }
 0x234   : > { %931 = dma.done.wait (!%p816_p3), %s703_s8, 2048  }
 0x235   : > { %933 = vsyncadd (!%p816_p3), %s703_s8, 4294965248  ;;  %s18_s23 = sadd.s32 1, %s956_s23   ;;  %s1295_s18 = smov %s940_s19 }
 0x236   : > { %p15_p5 = scmp.ge.s32.totalorder %s18_s23, 4   ;;  %s1296_s19 = smov %s944_s20 }
 0x237   : > { %s1297_s20 = smov %s1046_s6  ;;  %s1298_s21 = smov %s952_s22 }
 0x238   : > { %s1299_s22 = smov %s1301_s26  ;;  %17 = sbr.rel (!%p15_p5) target bundleno = 4 (0x4), region = 75 }
 0x23f   :  { %708 = vsyncpa [#allocation3], 1 }
 0x240   :  { %710 = vsyncpa [#allocation3 + $0x1], 1 }

</bundles_post_ra>
